<compile_context>
chip_gen: v7x
topology: tpu7x:2x2x1
jax: 0.10.0
libtpu: 0.0.40
codegen_flags: <defaults>
</compile_context>

<pallas_src>
import functools

import jax
import jax.numpy as jnp
from jax.experimental import pallas as pl
from jax.experimental.pallas import tpu as pltpu

LANE = 128  # TPU lane width; class dimension is padded to this for dense stores.


def _graphsage_fused_kernel(a_ref, x_ref, wl1_ref, wr1_ref, b1_ref,
                            wl2_ref, wr2_ref, b2_ref, o_ref, *, num_classes):
    """Fused forward pass.

    a_ref  : [N, N]    bf16  row-normalized adjacency (mean aggregation)
    x_ref  : [N, Fin]  bf16  node features
    wl1/wr1: [Fin, H]  bf16
    b1_ref : [1, H]    f32
    wl2/wr2: [H, Cp]   bf16  (classes zero-padded to Cp = 128)
    b2_ref : [1, Cp]   f32   (classes zero-padded)
    o_ref  : [N, Cp]   f32   log_softmax over the first `num_classes` lanes
    """
    a = a_ref[...]
    x = x_ref[...]

    # ---- Layer 1: h = relu((A @ x) @ W_l1 + x @ W_r1 + b1) ------------------
    agg_x = jnp.dot(a, x, preferred_element_type=jnp.float32).astype(jnp.bfloat16)
    h = (jnp.dot(agg_x, wl1_ref[...], preferred_element_type=jnp.float32)
         + jnp.dot(x, wr1_ref[...], preferred_element_type=jnp.float32)
         + b1_ref[...])
    h = jnp.maximum(h, 0.0)                       # [N, H] f32
    h16 = h.astype(jnp.bfloat16)

    # ---- Layer 2: logits = (A @ h) @ W_l2 + h @ W_r2 + b2 -------------------
    agg_h = jnp.dot(a, h16, preferred_element_type=jnp.float32).astype(jnp.bfloat16)
    logits = (jnp.dot(agg_h, wl2_ref[...], preferred_element_type=jnp.float32)
              + jnp.dot(h16, wr2_ref[...], preferred_element_type=jnp.float32)
              + b2_ref[...])                      # [N, Cp] f32

    # ---- log_softmax over the real classes only (padded lanes masked) -------
    lane = jax.lax.broadcasted_iota(jnp.int32, logits.shape, 1)
    valid = lane < num_classes
    logits = jnp.where(valid, logits, jnp.float32(-1e30))
    m = jnp.max(logits, axis=1, keepdims=True)
    s = logits - m
    e = jnp.where(valid, jnp.exp(s), 0.0)
    lse = jnp.log(jnp.sum(e, axis=1, keepdims=True))
    o_ref[...] = s - lse


def build_normalized_adjacency(edge_index, num_nodes):
    # edge_index: [2, E], row 0 = source j, row 1 = target i (message j -> i).
    src, dst = edge_index[0], edge_index[1]
    adj = jnp.zeros((num_nodes, num_nodes), jnp.float32).at[dst, src].add(1.0)
    deg = jnp.maximum(jnp.sum(adj, axis=1, keepdims=True), 1.0)  # isolated nodes -> 0 agg
    return adj / deg


def graphsage_forward(x, edge_index, params):
    n, _ = x.shape
    num_classes = params["w_l2"].shape[1]
    c_pad = LANE

    # MXU operands in bf16 (f32 accumulation inside the kernel).
    a_norm = build_normalized_adjacency(edge_index, n).astype(jnp.bfloat16)
    x_bf = x.astype(jnp.bfloat16)

    wl1 = params["w_l1"].astype(jnp.bfloat16)
    wr1 = params["w_r1"].astype(jnp.bfloat16)
    b1 = params["b1"].astype(jnp.float32)
    # Pad classes to 128 lanes so the output store is dense/unmasked.
    wl2 = jnp.pad(params["w_l2"], ((0, 0), (0, c_pad - num_classes))).astype(jnp.bfloat16)
    wr2 = jnp.pad(params["w_r2"], ((0, 0), (0, c_pad - num_classes))).astype(jnp.bfloat16)
    b2 = jnp.pad(params["b2"], ((0, 0), (0, c_pad - num_classes))).astype(jnp.float32)

    kernel = functools.partial(_graphsage_fused_kernel, num_classes=num_classes)
    vmem_spec = lambda: pl.BlockSpec(memory_space=pltpu.MemorySpace.VMEM)
    out_padded = pl.pallas_call(
        kernel,
        out_shape=jax.ShapeDtypeStruct((n, c_pad), jnp.float32),
        in_specs=[vmem_spec() for _ in range(8)],
        out_specs=vmem_spec(),
    )(a_norm, x_bf, wl1, wr1, b1, wl2, wr2, b2)
    return out_padded[:, :num_classes]


def graphsage_reference(x, edge_index, params):
    """Pure-JAX f32 reference (PyG SAGEConv mean semantics)."""
    a = build_normalized_adjacency(edge_index, x.shape[0])
    h = jnp.maximum((a @ x) @ params["w_l1"] + x @ params["w_r1"] + params["b1"], 0.0)
    o = (a @ h) @ params["w_l2"] + h @ params["w_r2"] + params["b2"]
    return jax.nn.log_softmax(o, axis=1)


def init_params(key, in_channels, hidden, out_channels):
    ks = jax.random.split(key, 4)

    def lin(k, fi, fo):
        bound = 1.0 / jnp.sqrt(fi)
        return jax.random.uniform(k, (fi, fo), jnp.float32, -bound, bound)

    return {
        "w_l1": lin(ks[0], in_channels, hidden),
        "w_r1": lin(ks[1], in_channels, hidden),
        "b1": jnp.zeros((1, hidden), jnp.float32),
        "w_l2": lin(ks[2], hidden, out_channels),
        "w_r2": lin(ks[3], hidden, out_channels),
        "b2": jnp.zeros((1, out_channels), jnp.float32),
    }


if __name__ == "__main__":
    N = 64            # nodes
    E = 256           # edges
    IN_CHANNELS = 8
    HIDDEN = 16       # SAGEConv(in_channels, 16)
    OUT_CHANNELS = 7

    key = jax.random.PRNGKey(0)
    k_x, k_src, k_dst, k_p = jax.random.split(key, 4)

    x = jax.random.normal(k_x, (N, IN_CHANNELS), jnp.float32)
    edge_index = jnp.stack([
        jax.random.randint(k_src, (E,), 0, N, jnp.int32),
        jax.random.randint(k_dst, (E,), 0, N, jnp.int32),
    ], axis=0)  # [2, E]

    params = init_params(k_p, IN_CHANNELS, HIDDEN, OUT_CHANNELS)

    fwd = jax.jit(graphsage_forward)
    out = jax.block_until_ready(fwd(x, edge_index, params))
    assert out.shape == (N, OUT_CHANNELS)
    # log_softmax rows must exponentiate-sum to 1.
    assert jnp.allclose(jnp.sum(jnp.exp(out), axis=1), 1.0, atol=1e-4)
    # Match the f32 reference (bf16 MXU operands -> loose tolerance).
    ref = graphsage_reference(x, edge_index, params)
    assert jnp.allclose(out, ref, atol=1e-1), float(jnp.max(jnp.abs(out - ref)))
    print("KERNEL_OK")
</pallas_src>

<mosaic_0001>
module attributes {stable_mosaic.version = 11 : i64} {
  func.func private @main(%arg0: i32) attributes {dimension_semantics = [#tpu.dimension_semantics<core_parallel>], iteration_bounds = array<i64: 2>, tpu.core_type = #tpu.core_type<sc_scalar_subcore>, window_params = []} {
    return
  }
}

module attributes {stable_mosaic.version = 11 : i64} {
  func.func private @main(%arg0: i32) attributes {dimension_semantics = [#tpu.dimension_semantics<core_parallel>], iteration_bounds = array<i64: 2>, tpu.core_type = #tpu.core_type<sc_scalar_subcore>, window_params = []} {
    return
  }
}

module attributes {stable_mosaic.version = 11 : i64} {
  func.func @_graphsage_fused_kernel(%arg0: memref<64x64xbf16, #tpu.memory_space<vmem>>, %arg1: memref<64x8xbf16, #tpu.memory_space<vmem>>, %arg2: memref<8x16xbf16, #tpu.memory_space<vmem>>, %arg3: memref<8x16xbf16, #tpu.memory_space<vmem>>, %arg4: memref<1x16xf32, #tpu.memory_space<vmem>>, %arg5: memref<16x128xbf16, #tpu.memory_space<vmem>>, %arg6: memref<16x128xbf16, #tpu.memory_space<vmem>>, %arg7: memref<1x128xf32, #tpu.memory_space<vmem>>, %arg8: memref<64x128xf32, #tpu.memory_space<vmem>>) attributes {dimension_semantics = [], scalar_prefetch = 0 : i64, scratch_operands = 0 : i64, tpu.core_type = #tpu.core_type<tc>} {
    %c0 = arith.constant 0 : index
    %c0_0 = arith.constant 0 : index
    %0 = vector.load %arg0[%c0, %c0_0] : memref<64x64xbf16, #tpu.memory_space<vmem>>, vector<64x64xbf16>
    %c0_1 = arith.constant 0 : index
    %c0_2 = arith.constant 0 : index
    %1 = vector.load %arg1[%c0_1, %c0_2] : memref<64x8xbf16, #tpu.memory_space<vmem>>, vector<64x8xbf16>
    %cst = arith.constant dense<0.000000e+00> : vector<64x8xf32>
    %2 = tpu.matmul %0, %1, %cst {dimension_numbers = #tpu.dot_dimension_numbers<[1], [0], [0], [1], [0, 0, 1, 1], [], []>} : vector<64x64xbf16>, vector<64x8xbf16>, vector<64x8xf32> -> vector<64x8xf32>
    %3 = arith.truncf %2 : vector<64x8xf32> to vector<64x8xbf16>
    %c0_3 = arith.constant 0 : index
    %c0_4 = arith.constant 0 : index
    %4 = vector.load %arg2[%c0_3, %c0_4] : memref<8x16xbf16, #tpu.memory_space<vmem>>, vector<8x16xbf16>
    %cst_5 = arith.constant dense<0.000000e+00> : vector<64x16xf32>
    %5 = tpu.matmul %3, %4, %cst_5 {dimension_numbers = #tpu.dot_dimension_numbers<[1], [0], [0], [1], [0, 0, 1, 1], [], []>} : vector<64x8xbf16>, vector<8x16xbf16>, vector<64x16xf32> -> vector<64x16xf32>
    %c0_6 = arith.constant 0 : index
    %c0_7 = arith.constant 0 : index
    %6 = vector.load %arg3[%c0_6, %c0_7] : memref<8x16xbf16, #tpu.memory_space<vmem>>, vector<8x16xbf16>
    %cst_8 = arith.constant dense<0.000000e+00> : vector<64x16xf32>
    %7 = tpu.matmul %1, %6, %cst_8 {dimension_numbers = #tpu.dot_dimension_numbers<[1], [0], [0], [1], [0, 0, 1, 1], [], []>} : vector<64x8xbf16>, vector<8x16xbf16>, vector<64x16xf32> -> vector<64x16xf32>
    %8 = arith.addf %5, %7 : vector<64x16xf32>
    %c0_9 = arith.constant 0 : index
    %c0_10 = arith.constant 0 : index
    %9 = vector.load %arg4[%c0_9, %c0_10] : memref<1x16xf32, #tpu.memory_space<vmem>>, vector<1x16xf32>
    %10 = vector.broadcast %9 : vector<1x16xf32> to vector<64x16xf32>
    %11 = arith.addf %8, %10 : vector<64x16xf32>
    %cst_11 = arith.constant 0.000000e+00 : f32
    %12 = vector.broadcast %cst_11 : f32 to vector<64x16xf32>
    %13 = arith.maximumf %11, %12 : vector<64x16xf32>
    %14 = arith.truncf %13 : vector<64x16xf32> to vector<64x16xbf16>
    %cst_12 = arith.constant dense<0.000000e+00> : vector<64x16xf32>
    %15 = tpu.matmul %0, %14, %cst_12 {dimension_numbers = #tpu.dot_dimension_numbers<[1], [0], [0], [1], [0, 0, 1, 1], [], []>} : vector<64x64xbf16>, vector<64x16xbf16>, vector<64x16xf32> -> vector<64x16xf32>
    %16 = arith.truncf %15 : vector<64x16xf32> to vector<64x16xbf16>
    %c0_13 = arith.constant 0 : index
    %c0_14 = arith.constant 0 : index
    %17 = vector.load %arg5[%c0_13, %c0_14] : memref<16x128xbf16, #tpu.memory_space<vmem>>, vector<16x128xbf16>
    %cst_15 = arith.constant dense<0.000000e+00> : vector<64x128xf32>
    %18 = tpu.matmul %16, %17, %cst_15 {dimension_numbers = #tpu.dot_dimension_numbers<[1], [0], [0], [1], [0, 0, 1, 1], [], []>} : vector<64x16xbf16>, vector<16x128xbf16>, vector<64x128xf32> -> vector<64x128xf32>
    %c0_16 = arith.constant 0 : index
    %c0_17 = arith.constant 0 : index
    %19 = vector.load %arg6[%c0_16, %c0_17] : memref<16x128xbf16, #tpu.memory_space<vmem>>, vector<16x128xbf16>
    %cst_18 = arith.constant dense<0.000000e+00> : vector<64x128xf32>
    %20 = tpu.matmul %14, %19, %cst_18 {dimension_numbers = #tpu.dot_dimension_numbers<[1], [0], [0], [1], [0, 0, 1, 1], [], []>} : vector<64x16xbf16>, vector<16x128xbf16>, vector<64x128xf32> -> vector<64x128xf32>
    %21 = arith.addf %18, %20 : vector<64x128xf32>
    %c0_19 = arith.constant 0 : index
    %c0_20 = arith.constant 0 : index
    %22 = vector.load %arg7[%c0_19, %c0_20] : memref<1x128xf32, #tpu.memory_space<vmem>>, vector<1x128xf32>
    %23 = vector.broadcast %22 : vector<1x128xf32> to vector<64x128xf32>
    %24 = arith.addf %21, %23 : vector<64x128xf32>
    %25 = tpu.iota {dimensions = array<i32: 1>} : vector<64x128xi32>
    %c7_i32 = arith.constant 7 : i32
    %26 = vector.broadcast %c7_i32 : i32 to vector<64x128xi32>
    %27 = arith.cmpi slt, %25, %26 : vector<64x128xi32>
    %cst_21 = arith.constant -1.000000e+30 : f32
    %28 = vector.broadcast %cst_21 : f32 to vector<64x128xf32>
    %29 = arith.select %27, %24, %28 : vector<64x128xi1>, vector<64x128xf32>
    %cst_22 = arith.constant dense<0xFF800000> : vector<64xf32>
    %30 = vector.multi_reduction <maximumf>, %29, %cst_22 [1] : vector<64x128xf32> to vector<64xf32>
    %31 = vector.shape_cast %30 : vector<64xf32> to vector<64x1xf32>
    %32 = vector.broadcast %31 : vector<64x1xf32> to vector<64x128xf32>
    %33 = arith.subf %29, %32 : vector<64x128xf32>
    %34 = math.exp %33 : vector<64x128xf32>
    %cst_23 = arith.constant 0.000000e+00 : f32
    %35 = vector.broadcast %cst_23 : f32 to vector<64x128xf32>
    %36 = arith.select %27, %34, %35 : vector<64x128xi1>, vector<64x128xf32>
    %cst_24 = arith.constant dense<0.000000e+00> : vector<64xf32>
    %37 = vector.multi_reduction <add>, %36, %cst_24 [1] : vector<64x128xf32> to vector<64xf32>
    %38 = vector.shape_cast %37 : vector<64xf32> to vector<64x1xf32>
    %39 = math.log %38 : vector<64x1xf32>
    %40 = vector.broadcast %39 : vector<64x1xf32> to vector<64x128xf32>
    %41 = arith.subf %33, %40 : vector<64x128xf32>
    %c0_25 = arith.constant 0 : index
    %c0_26 = arith.constant 0 : index
    %42 = vector.load %arg8[%c0_25, %c0_26] : memref<64x128xf32, #tpu.memory_space<vmem>>, vector<64x128xf32>
    tpu.vector_store %arg8[%c0_25, %c0_26], %41 {strides = array<i32>} : memref<64x128xf32, #tpu.memory_space<vmem>>, vector<64x128xf32>,
    return
  }
}

</mosaic_0001>

<bundles_post_ra>
// kernel: graphsage_forward.1
= control target key start
LH: loop header
LB: loop body
LE: loop exit
PB: predicated region body
PF: predicated region fallthrough
CT: control target
= control target key end

     0   :  { %vm174_vm0 = vcmask 64512   ;;  %vm90_vm1 = vcmask 523264   ;;  %vm187_vm2 = vcmask 1043456   ;;  %vm442_vm3 = vcmask 130048   ;;  %s1149_s1 = inlined_call_operand.vmem [shape: bf16[64,8], index: 1, kind: input, shape index: {}]   ;;  %s1150_s0 = inlined_call_operand.vmem [shape: bf16[64,64], index: 0, kind: input, shape index: {}]   ;;  %s1151_s3 = inlined_call_operand.vmem [shape: bf16[8,16], index: 3, kind: input, shape index: {}]   ;;  %s1152_s2 = inlined_call_operand.vmem [shape: bf16[8,16], index: 2, kind: input, shape index: {}]   ;;  %s1153_s6 = inlined_call_operand.vmem [shape: bf16[16,128], index: 6, kind: input, shape index: {}]   ;;  %s1154_s5 = inlined_call_operand.vmem [shape: bf16[16,128], index: 5, kind: input, shape index: {}]   ;;  %s1155_s4 = inlined_call_operand.vmem [shape: f32[1,16], index: 4, kind: input, shape index: {}]   ;;  %s1156_s7 = inlined_call_operand.vmem [shape: f32[1,128], index: 7, kind: input, shape index: {}]   ;;  %s1157_s8 = inlined_call_operand.vmem [shape: f32[64,128], index: 8, kind: output, shape index: {}]  }
   0x1   :  { %v893_v0 = vld [vmem:[%s1149_s1] sm:$0xff]   ;;  %v894_v1 = vld [vmem:[%s1149_s1 + $0x8] sm:$0xff]   ;;  %v895_v2 = vld [vmem:[%s1149_s1 + $0x10] sm:$0xff]  }
   0x2   :  { %801 = vmatprep.subr.bf16.mxu0 %v893_v0  ;;  %819 = vmatprep.mubr.msk.bf16.mxu1 %vm174_vm0, %v893_v0  ;;  %v897_v3 = vld [vmem:[%s1150_s0] sm:$0xff]   ;;  %v896_v4 = vld [vmem:[%s1149_s1 + $0x18] sm:$0xff]   ;;  %v1007_v9 = vld [vmem:[%s1150_s0 + $0x8] sm:$0xff]  }
   0x3   :  { %802 = vmatpush3.bf16.msra.mxu0 %v893_v0  ;;  %809 = vmatprep.mubr.msk.bf16.mxu0 %vm90_vm1, %v897_v3  ;;  %v173_v5 = vld [vmem:[%s1151_s3] sm:$0xf]  ;;  %v1013_v10 = vld [vmem:[%s1150_s0 + $0x10] sm:$0xff]   ;;  %v1023_v11 = vld [vmem:[%s1150_s0 + $0x18] sm:$0xff]  }
   0x4   :  { %803 = vmatprep.subr.bf16.mxu0 %v894_v1  ;;  %v172_v6 = vld [vmem:[%s1152_s2] sm:$0xf]  ;;  %891 = vmatprep.subr.msk.bf16.mxu1 %vm187_vm2, %v173_v5  ;;  %v189_v7 = vsel %vm187_vm2, %v173_v5, 0 }
   0x5   :  { %818 = vmatpush3.bf16.msra.mxu1 %v189_v7  ;;  %v269_v8 = vsel %vm187_vm2, %v172_v6, 0  ;;  %v901_v24 = vld [vmem:[%s1153_s6] sm:$0xff]   ;;  %v618_v7 = vlaneseq }
   0x6   :  { %892 = vmatprep.subr.msk.bf16.mxu1 %vm187_vm2, %v172_v6  ;;  %v902_v25 = vld [vmem:[%s1154_s5] sm:$0xff]  }
   0x7   :  { %804 = vmatpush3.bf16.msra.mxu0 %v894_v1  ;;  %v749_v26 = vld [vmem:[%s1155_s4] ss:$0 sm:$0xff] }
   0x8   :  { %805 = vmatprep.subr.bf16.mxu0 %v895_v2  ;;  %820 = vmatmul.mubr.msk.bf16.vlgmr.msra.gmra.mrb[0].mxu1 %vm174_vm0, %v894_v1 }
   0x9   :  { %828 = vmatpush3.bf16.msra.mxu1 %v269_v8  ;;  %823 = vmatprep.mubr.msk.bf16.mxu1 %vm174_vm0, %v895_v2  ;;  %v1055_v8 = vand.u32 127, %v618_v7 }
   0xa   :  { %873 = vmatprep.subr.bf16.mxu1 %v901_v24 }
   0xb   :  { %806 = vmatpush3.bf16.msra.mxu0 %v895_v2  ;;  %vm620_vm4 = vcmp.lt.s32.totalorder %v1055_v8, 7 }
   0xc   :  { %807 = vmatprep.subr.bf16.mxu0 %v896_v4 }
   0xf   :  { %808 = vmatpush3.bf16.msra.mxu0 %v896_v4 }
  0x10   :  { %824 = vmatmul.mubr.msk.bf16.gmra.mrb[4].mxu1 %vm174_vm0, %v896_v4 }
  0x12   :  { %810 = vmatmul.mubr.msk.bf16.vlgmr.msra.gmra.mrb[0].mxu0 %vm90_vm1, %v1007_v9 }
  0x13   :  { %813 = vmatprep.mubr.msk.bf16.mxu0 %vm90_vm1, %v1013_v10 }
  0x1a   :  { %814 = vmatmul.mubr.msk.bf16.gmra.mrb[4].mxu0 %vm90_vm1, %v1023_v11 }
  0x1b   :  { %845 = vmatprep.mubr.msk.bf16.mxu0 %vm90_vm1, %v897_v3 }
  0xe5   :  { %v811_v12 = vpop.f32.mrb[0].mxu0 }
  0xe6   :  { %v137_v13 = vpop.f32.mrb[1].mxu0 }
  0xe7   :  { %v812_v14 = vpop.f32.mrb[2].mxu0 }
  0xe8   :  { %v169_v15 = vpack.c.bf16 %v812_v14, %v811_v12  ;;  %v140_v16 = vpop.f32.mrb[3].mxu0 }
  0xe9   :  { %v168_v17 = vpack.c.bf16 %v140_v16, %v137_v13 }
  0xeb   :  { %829 = vmatprep.mubr.msk.bf16.mxu1 %vm174_vm0, %v168_v17 }
  0xec   :  { %830 = vmatmul.mubr.msk.bf16.vlgmr.msra.gmra.mrb[0].mxu1 %vm174_vm0, %v169_v15 }
  0xed   :  { %v815_v18 = vpop.f32.mrb[4].mxu0  ;;  %874 = vmatpush3.bf16.msra.mxu1 %v901_v24 }
  0xee   :  { %v153_v19 = vpop.f32.mrb[5].mxu0  ;;  %863 = vmatprep.subr.bf16.mxu1 %v902_v25 }
  0xef   :  { %v816_v20 = vpop.f32.mrb[6].mxu0 }
  0xf0   :  { %v171_v21 = vpack.c.bf16 %v816_v20, %v815_v18  ;;  %v156_v22 = vpop.f32.mrb[7].mxu0 }
  0xf1   :  { %v170_v23 = vpack.c.bf16 %v156_v22, %v153_v19 }
  0xf3   :  { %833 = vmatprep.mubr.msk.bf16.mxu1 %vm174_vm0, %v170_v23 }
  0xf4   :  { %834 = vmatmul.mubr.msk.bf16.gmra.mrb[4].mxu1 %vm174_vm0, %v171_v21 }
 0x1bf   :  { %v831_v27 = vpop.f32.mrb[0].mxu1 }
 0x1c0   :  { %v345_v28 = vadd.f32 %v831_v27, %v749_v26  ;;  %v305_v29 = vpop.f32.mrb[1].mxu1 }
 0x1c1   :  { %v343_v30 = vadd.f32 %v749_v26, %v305_v29  ;;  %v832_v31 = vpop.f32.mrb[2].mxu1 }
 0x1c2   :  { %v346_v32 = vadd.f32 %v832_v31, %v749_v26  ;;  %v308_v33 = vpop.f32.mrb[3].mxu1  ;;  %v353_v35 = vmax.f32 %v345_v28, 0.0 }
 0x1c3   :  { %v344_v34 = vadd.f32 %v749_v26, %v308_v33  ;;  %v351_v37 = vmax.f32 %v343_v30, 0.0 }
 0x1c4   :  { %v354_v36 = vmax.f32 %v346_v32, 0.0 }
 0x1c5   :  { %v352_v38 = vmax.f32 %v344_v34, 0.0 }
 0x1c6   :  { %v360_v39 = vpack.c.bf16 %v354_v36, %v353_v35 }
 0x1c7   :  { %v359_v40 = vpack.c.bf16 %v352_v38, %v351_v37  ;;  %v835_v41 = vpop.f32.mrb[4].mxu1 }
 0x1c8   :  { %v349_v42 = vadd.f32 %v835_v41, %v749_v26  ;;  %v321_v43 = vpop.f32.mrb[5].mxu1 }
 0x1c9   :  { %v347_v44 = vadd.f32 %v749_v26, %v321_v43  ;;  %v836_v45 = vpop.f32.mrb[6].mxu1  ;;  %837 = vmatprep.subr.bf16.mxu0 %v359_v40 }
 0x1ca   :  { %v350_v46 = vadd.f32 %v836_v45, %v749_v26  ;;  %v324_v47 = vpop.f32.mrb[7].mxu1  ;;  %838 = vmatpush3.bf16.msra.mxu0 %v359_v40  ;;  %v357_v49 = vmax.f32 %v349_v42, 0.0 }
 0x1cb   :  { %v348_v48 = vadd.f32 %v749_v26, %v324_v47  ;;  %839 = vmatprep.subr.bf16.mxu0 %v360_v39  ;;  %v355_v51 = vmax.f32 %v347_v44, 0.0 }
 0x1cc   :  { %v358_v50 = vmax.f32 %v350_v46, 0.0 }
 0x1cd   :  { %v356_v52 = vmax.f32 %v348_v48, 0.0 }
 0x1ce   :  { %v362_v53 = vpack.c.bf16 %v358_v50, %v357_v49  ;;  %840 = vmatpush3.bf16.msra.mxu0 %v360_v39 }
 0x1cf   :  { %v361_v54 = vpack.c.bf16 %v356_v52, %v355_v51 }
 0x1d1   :  { %841 = vmatprep.subr.bf16.mxu0 %v361_v54  ;;  %859 = vmatprep.mubr.msk.bf16.mxu1 %vm442_vm3, %v361_v54 }
 0x1d2   :  { %842 = vmatpush3.bf16.msra.mxu0 %v361_v54  ;;  %860 = vmatmul.mubr.msk.bf16.vlgmr.msra.gmra.mrb[8].mxu1 %vm442_vm3, %v362_v53 }
 0x1d3   :  { %843 = vmatprep.subr.bf16.mxu0 %v362_v53  ;;  %864 = vmatpush3.bf16.msra.mxu1 %v902_v25 }
 0x1d6   :  { %844 = vmatpush3.bf16.msra.mxu0 %v362_v53 }
 0x1d7   :  { %853 = vmatprep.subr.bf16.mxu0 %v901_v24 }
 0x1d9   :  { %846 = vmatmul.mubr.msk.bf16.vlgmr.msra.gmra.mrb[8].mxu0 %vm90_vm1, %v1007_v9 }
 0x1da   :  { %849 = vmatprep.mubr.msk.bf16.mxu0 %vm90_vm1, %v1013_v10  ;;  %854 = vmatpush3.bf16.msra.mxu0 %v901_v24  ;;  %v764_v10 = vld [vmem:[%s1156_s7] ss:$0 sm:$0xff] }
 0x1e1   :  { %850 = vmatmul.mubr.msk.bf16.gmra.mrb[12].mxu0 %vm90_vm1, %v1023_v11 }
 0x1e2   :  { %855 = vmatprep.mubr.msk.bf16.mxu0 %vm442_vm3, %v359_v40 }
 0x1e9   :  { %856 = vmatmul.mubr.msk.bf16.vlgmr.msra.gmra.mrb[16].mxu0 %vm442_vm3, %v360_v39 }
 0x2ac   :  { %v847_v55 = vpop.f32.mrb[8].mxu0 }
 0x2ad   :  { %v397_v56 = vpop.f32.mrb[9].mxu0 }
 0x2ae   :  { %v848_v57 = vpop.f32.mrb[10].mxu0 }
 0x2af   :  { %v429_v58 = vpack.c.bf16 %v848_v57, %v847_v55  ;;  %v400_v59 = vpop.f32.mrb[11].mxu0 }
 0x2b0   :  { %v428_v60 = vpack.c.bf16 %v400_v59, %v397_v56 }
 0x2b2   :  { %865 = vmatprep.mubr.msk.bf16.mxu1 %vm442_vm3, %v428_v60 }
 0x2b3   :  { %866 = vmatmul.mubr.msk.bf16.vlgmr.msra.gmra.mrb[12].mxu1 %vm442_vm3, %v429_v58 }
 0x2b4   :  { %v851_v61 = vpop.f32.mrb[12].mxu0 }
 0x2b5   :  { %v413_v62 = vpop.f32.mrb[13].mxu0 }
 0x2b6   :  { %v852_v63 = vpop.f32.mrb[14].mxu0 }
 0x2b7   :  { %v431_v0 = vpack.c.bf16 %v852_v63, %v851_v61  ;;  %v416_v1 = vpop.f32.mrb[15].mxu0 }
 0x2b8   :  { %v430_v2 = vpack.c.bf16 %v416_v1, %v413_v62 }
 0x2ba   :  { %869 = vmatprep.mubr.msk.bf16.mxu1 %vm442_vm3, %v430_v2 }
 0x2bb   :  { %870 = vmatmul.mubr.msk.bf16.gmra.mrb[8].mxu1 %vm442_vm3, %v431_v0 }
 0x2bc   :  { %v857_v3 = vpop.f32.mrb[16].mxu0 }
 0x2bd   :  { %v489_v4 = vpop.f32.mrb[17].mxu0 }
 0x2be   :  { %v858_v5 = vpop.f32.mrb[18].mxu0 }
 0x2bf   :  { %v492_v6 = vpop.f32.mrb[19].mxu0 }
 0x386   :  { %v867_v9 = vpop.f32.mrb[12].mxu1 }
 0x387   :  { %v581_v11 = vadd.f32 %v867_v9, %v857_v3  ;;  %v572_v12 = vpop.f32.mrb[13].mxu1 }
 0x388   :  { %v573_v13 = vadd.f32 %v572_v12, %v489_v4  ;;  %v868_v14 = vpop.f32.mrb[14].mxu1 }
 0x389   :  { %v584_v15 = vadd.f32 %v868_v14, %v858_v5  ;;  %v575_v16 = vpop.f32.mrb[15].mxu1  ;;  %v612_v17 = vadd.f32 %v764_v10, %v581_v11 }
 0x38a   :  { %v576_v18 = vadd.f32 %v575_v16, %v492_v6  ;;  %v610_v19 = vadd.f32 %v764_v10, %v573_v13 }
 0x38b   :  { %v623_v20 = vsel %vm620_vm4, %v612_v17, -1e+30  ;;  %v613_v21 = vadd.f32 %v764_v10, %v584_v15 }
 0x38c   :  { %633 = vmax.xlane.f32.xlu1 %v623_v20  ;;  %v621_v22 = vsel %vm620_vm4, %v610_v19, -1e+30  ;;  %v611_v23 = vadd.f32 %v764_v10, %v576_v18 }
 0x38d   :  { %629 = vmax.xlane.f32.xlu0 %v621_v22  ;;  %v624_v26 = vsel %vm620_vm4, %v613_v21, -1e+30 }
 0x38e   :  { %v871_v24 = vpop.f32.mrb[8].mxu1  ;;  %v622_v29 = vsel %vm620_vm4, %v611_v23, -1e+30 }
 0x38f   :  { %v588_v25 = vpop.f32.mrb[9].mxu1  ;;  %v616_v32 = vadd.f32 %v871_v24, %v764_v10 }
 0x390   :  { %v614_v27 = vadd.f32 %v764_v10, %v588_v25  ;;  %635 = vmax.xlane.f32.xlu1 %v624_v26  ;;  %v872_v28 = vpop.f32.mrb[10].mxu1 }
 0x391   :  { %631 = vmax.xlane.f32.xlu0 %v622_v29  ;;  %v591_v30 = vpop.f32.mrb[11].mxu1  ;;  %v617_v33 = vadd.f32 %v872_v28, %v764_v10  ;;  %v627_v36 = vsel %vm620_vm4, %v616_v32, -1e+30 }
 0x392   :  { %v615_v31 = vadd.f32 %v764_v10, %v591_v30  ;;  %v625_v34 = vsel %vm620_vm4, %v614_v27, -1e+30 }
 0x393   :  { %v628_v37 = vsel %vm620_vm4, %v617_v33, -1e+30 }
 0x394   :  { %v626_v35 = vsel %vm620_vm4, %v615_v31, -1e+30 }
 0x395   :  { %637 = vmax.xlane.f32.xlu0 %v625_v34  ;;  %639 = vmax.xlane.f32.xlu1 %v626_v35 }
 0x399   :  { %641 = vmax.xlane.f32.xlu0 %v627_v36  ;;  %643 = vmax.xlane.f32.xlu1 %v628_v37 }
 0x419   :  { %v634_v38 = vpop.xlane.xlu1 %633 }
 0x41a   :  { %v1077_v39 = vsub.f32 %v623_v20, %v634_v38  ;;  %v630_v40 = vpop.xlane.xlu0 %629 }
 0x41b   :  { %v1079_v41 = vsub.f32 %v621_v22, %v630_v40 }
 0x41c   :  { %v657_v42 = vmul.f32 1.442695, %v1077_v39 }
 0x41d   :  { %v653_v43 = vmul.f32 1.442695, %v1079_v41  ;;  %v636_v44 = vpop.xlane.xlu1 %635 }
 0x41e   :  { %903 = vpow2.f32 %v657_v42  ;;  %v1083_v45 = vsub.f32 %v624_v26, %v636_v44  ;;  %v632_v46 = vpop.xlane.xlu0 %631 }
 0x41f   :  { %v1085_v47 = vsub.f32 %v622_v29, %v632_v46  ;;  %905 = vpow2.f32 %v653_v43 }
 0x420   :  { %v659_v48 = vmul.f32 1.442695, %v1083_v45 }
 0x421   :  { %v655_v49 = vmul.f32 1.442695, %v1085_v47 }
 0x422   :  { %907 = vpow2.f32 %v659_v48  ;;  %v638_v50 = vpop.xlane.xlu0 %637  ;;  %v640_v51 = vpop.xlane.xlu1 %639 }
 0x423   :  { %v1089_v52 = vsub.f32 %v625_v34, %v638_v50  ;;  %v1091_v53 = vsub.f32 %v626_v35, %v640_v51  ;;  %909 = vpow2.f32 %v655_v49 }
 0x425   :  { %v661_v54 = vmul.f32 1.442695, %v1089_v52  ;;  %v663_v55 = vmul.f32 1.442695, %v1091_v53 }
 0x426   :  { %v642_v56 = vpop.xlane.xlu0 %641  ;;  %v644_v57 = vpop.xlane.xlu1 %643 }
 0x427   :  { %911 = vpow2.f32 %v661_v54  ;;  %v1095_v58 = vsub.f32 %v627_v36, %v642_v56  ;;  %v1097_v59 = vsub.f32 %v628_v37, %v644_v57 }
 0x428   :  { %v904_v60 = vpop.eup %903  ;;  %913 = vpow2.f32 %v663_v55 }
 0x429   :  { %v665_v61 = vmul.f32 1.442695, %v1095_v58  ;;  %v667_v62 = vmul.f32 1.442695, %v1097_v59  ;;  %v671_v63 = vsel %vm620_vm4, %v904_v60, 0.0  ;;  %v906_v0 = vpop.eup %905 }
 0x42a   :  { %681 = vadd.xlane.f32.xlu0 %v671_v63  ;;  %v669_v2 = vsel %vm620_vm4, %v906_v0, 0.0 }
 0x42b   :  { %915 = vpow2.f32 %v665_v61 }
 0x42c   :  { %v908_v1 = vpop.eup %907  ;;  %917 = vpow2.f32 %v667_v62 }
 0x42d   :  { %v672_v3 = vsel %vm620_vm4, %v908_v1, 0.0  ;;  %v910_v4 = vpop.eup %909 }
 0x42e   :  { %677 = vadd.xlane.f32.xlu0 %v669_v2  ;;  %683 = vadd.xlane.f32.xlu1 %v672_v3  ;;  %v670_v6 = vsel %vm620_vm4, %v910_v4, 0.0 }
 0x431   :  { %v912_v5 = vpop.eup %911 }
 0x432   :  { %v914_v7 = vpop.eup %913  ;;  %679 = vadd.xlane.f32.xlu1 %v670_v6  ;;  %v673_v9 = vsel %vm620_vm4, %v912_v5, 0.0 }
 0x433   :  { %685 = vadd.xlane.f32.xlu0 %v673_v9  ;;  %v674_v11 = vsel %vm620_vm4, %v914_v7, 0.0 }
 0x435   :  { %v916_v10 = vpop.eup %915 }
 0x436   :  { %v918_v12 = vpop.eup %917  ;;  %687 = vadd.xlane.f32.xlu1 %v674_v11  ;;  %v675_v13 = vsel %vm620_vm4, %v916_v10, 0.0 }
 0x437   :  { %689 = vadd.xlane.f32.xlu0 %v675_v13  ;;  %v676_v14 = vsel %vm620_vm4, %v918_v12, 0.0 }
 0x43a   :  { %691 = vadd.xlane.f32.xlu1 %v676_v14 }
 0x4b7   :  { %v682_v15 = vpop.xlane.xlu0 %681 }
 0x4b8   :  { %919 = vlog2.f32 %v682_v15 }
 0x4bb   :  { %v678_v16 = vpop.xlane.xlu0 %677  ;;  %v684_v17 = vpop.xlane.xlu1 %683 }
 0x4bc   :  { %921 = vlog2.f32 %v678_v16 }
 0x4bd   :  { %923 = vlog2.f32 %v684_v17 }
 0x4bf   :  { %v680_v18 = vpop.xlane.xlu1 %679 }
 0x4c0   :  { %925 = vlog2.f32 %v680_v18  ;;  %v686_v19 = vpop.xlane.xlu0 %685 }
 0x4c1   :  { %927 = vlog2.f32 %v686_v19 }
 0x4c2   :  { %v920_v20 = vpop.eup %919 }
 0x4c3   :  { %v698_v21 = vmul.f32 0.6931472, %v920_v20  ;;  %v688_v22 = vpop.xlane.xlu1 %687 }
 0x4c4   :  { %929 = vlog2.f32 %v688_v22  ;;  %v690_v23 = vpop.xlane.xlu0 %689 }
 0x4c5   :  { %v711_v24 = vsub.f32 %v1077_v39, %v698_v21  ;;  %931 = vlog2.f32 %v690_v23 }
 0x4c6   :  { %v922_v8 = vpop.eup %921 }
 0x4c7   :  { %v924_v25 = vpop.eup %923  ;;  %719 = vst [vmem:[%s1157_s8 + $0x10] sm:$0xff] %v711_v24  ;;  %v694_v26 = vmul.f32 0.6931472, %v922_v8  ;;  %v692_v27 = vpop.xlane.xlu1 %691 }
 0x4c8   :  { %v700_v28 = vmul.f32 0.6931472, %v924_v25  ;;  %933 = vlog2.f32 %v692_v27 }
 0x4c9   :  { %v709_v29 = vsub.f32 %v1079_v41, %v694_v26 }
 0x4ca   :  { %v926_v30 = vpop.eup %925  ;;  %v712_v31 = vsub.f32 %v1083_v45, %v700_v28 }
 0x4cb   :  { %v928_v32 = vpop.eup %927  ;;  %717 = vst [vmem:[%s1157_s8] sm:$0xff] %v709_v29  ;;  %v696_v33 = vmul.f32 0.6931472, %v926_v30 }
 0x4cc   :  { %720 = vst [vmem:[%s1157_s8 + $0x18] sm:$0xff] %v712_v31  ;;  %v702_v34 = vmul.f32 0.6931472, %v928_v32 }
 0x4cd   :  { %v710_v35 = vsub.f32 %v1085_v47, %v696_v33 }
 0x4ce   :  { %v930_v36 = vpop.eup %929  ;;  %v713_v37 = vsub.f32 %v1089_v52, %v702_v34 }
 0x4cf   :  { %v932_v38 = vpop.eup %931  ;;  %718 = vst [vmem:[%s1157_s8 + $0x8] sm:$0xff] %v710_v35  ;;  %v704_v39 = vmul.f32 0.6931472, %v930_v36 }
 0x4d0   :  { %721 = vst [vmem:[%s1157_s8 + $0x20] sm:$0xff] %v713_v37  ;;  %v706_v40 = vmul.f32 0.6931472, %v932_v38 }
 0x4d1   :  { %v714_v41 = vsub.f32 %v1091_v53, %v704_v39 }
 0x4d2   :  { %v934_v42 = vpop.eup %933  ;;  %v715_v43 = vsub.f32 %v1095_v58, %v706_v40 }
 0x4d3   :  { %722 = vst [vmem:[%s1157_s8 + $0x28] sm:$0xff] %v714_v41  ;;  %v708_v44 = vmul.f32 0.6931472, %v934_v42 }
 0x4d4   :  { %723 = vst [vmem:[%s1157_s8 + $0x30] sm:$0xff] %v715_v43 }
 0x4d5   :  { %v716_v45 = vsub.f32 %v1097_v59, %v708_v44 }
 0x4d7   :  { %724 = vst [vmem:[%s1157_s8 + $0x38] sm:$0xff] %v716_v45 }

</bundles_post_ra>
